<compile_context>
chip_gen: v5e
topology: v5e:2x2
jax: 0.10.0
libtpu: 0.0.40
codegen_flags: <defaults>
</compile_context>

<pallas_src>
import functools

import jax
import jax.numpy as jnp
from jax import lax
from jax.experimental import pallas as pl
from jax.experimental.pallas import tpu as pltpu

_LANE = 128
_SUBLANE = 8
_ITEMSIZE = 4                              # budget at f32 (conservative for bf16)
_MAX_C_BLOCK = 128                         # channels per grid step (C tiled beyond)
_UNROLLED_C = 16                           # fully unroll the channel loop up to this
_TARGET_BLOCK_BYTES = 8 * 1024 * 1024      # ~8 MiB input block target
_SINGLE_STEP_BYTES = 2 * 1024 * 1024       # below this, collapse to one grid step
_VMEM_LIMIT_BYTES = 48 * 1024 * 1024       # < v7x 64 MiB physical, > default scoped


# --------------------------------------------------------------------------- #
# Primary path: H*W is a multiple of 128 -> (N, C, R, 128) channels-leading.
# --------------------------------------------------------------------------- #
def _lane_aligned_kernel(x_ref, o_ref, *acc_refs, total_c, num_c_blocks):
    """One (nb, cb, tr, 128) block.  Channels are a leading dim, so every channel
    slab is a dense (tr, 128) lane/sublane tile and the channel reduction is pure
    elementwise VPU/EUP work (no cross-lane XLU reduce).  Only an (nb, tr, 128)
    running max / running exp-sum stays live (no full-block exp(x-m) temporary).
    When num_c_blocks > 1 the reduction is carried across the innermost
    ("arbitrary") grid axis via the two VMEM scratch accumulators."""
    nb, cb, tr, _ = x_ref.shape
    multi = num_c_blocks > 1
    partial_tail = (total_c % cb) != 0
    ci = pl.program_id(2)
    c0 = ci * cb                                   # global channel offset
    neg_inf = jnp.float32(-jnp.inf)

    def slab(c):
        # One channel slab (nb, tr, 128); `c` may be a traced loop index.
        return x_ref[:, pl.ds(c, 1), :, :][:, 0].astype(jnp.float32)

    def reduce_channels(update, init):
        if cb <= _UNROLLED_C:
            acc = init
            for c in range(cb):
                acc = update(c, acc)
            return acc
        return lax.fori_loop(0, cb, update, init)

    # Pass 1: block max over channels.
    def max_step(c, m):
        xc = slab(c)
        if partial_tail:
            xc = jnp.where(c0 + c < total_c, xc, neg_inf)
        return jnp.maximum(m, xc)

    m_blk = reduce_channels(
        max_step, jnp.full((nb, tr, _LANE), neg_inf, jnp.float32))

    if multi:
        m_acc, s_acc = acc_refs

        @pl.when(ci == 0)
        def _():
            m_acc[...] = jnp.full_like(m_acc, neg_inf)
            s_acc[...] = jnp.zeros_like(s_acc)

        m_prev = m_acc[...]
        m_new = jnp.maximum(m_prev, m_blk)
        # Rescale the previous partial exp-sum (exp(-inf) = 0 on the first step).
        s_init = s_acc[...] * jnp.exp(m_prev - m_new)
    else:
        m_new = m_blk
        s_init = jnp.zeros((nb, tr, _LANE), jnp.float32)

    # Pass 2: running sum of exp(x - m_new).  Re-reading slabs from VMEM is
    # cheap (3 vld slots/cycle) and keeps vreg/VMEM pressure at one slab.
    def sum_step(c, s):
        e = jnp.exp(slab(c) - m_new)
        if partial_tail:
            e = jnp.where(c0 + c < total_c, e, jnp.float32(0.0))
        return s + e

    s = reduce_channels(sum_step, s_init)

    def finalize():
        # max(softmax(x)) == 1 / sum(exp(x - max(x))) (the max channel's term is
        # exp(0) = 1), so y = -1 / s.  Exact divide (not approx reciprocal) keeps
        # the 1e-5 tolerance; the kernel is HBM-bound anyway.
        o_ref[...] = (-1.0 / s).astype(o_ref.dtype)

    if multi:
        @pl.when(ci < num_c_blocks - 1)
        def _():
            m_acc[...] = m_new
            s_acc[...] = s

        @pl.when(ci == num_c_blocks - 1)
        def _():
            finalize()
    else:
        finalize()


def _choose_tiles(N, C, R):
    """Pick (nb, tr, cb) = batch / spatial-row / channel block sizes.

    Budget: 2*input_block + 2*output_block + 2*scratch ~= 2*block*(1 + 2/cb),
    kept well under _VMEM_LIMIT_BYTES on every generation (v5e/v6e/v7x)."""
    cb = C if C <= _MAX_C_BLOCK else _MAX_C_BLOCK
    nc = pl.cdiv(C, cb)

    row_bytes = cb * _LANE * _ITEMSIZE            # one (cb, 1, 128) column slice
    elem_bytes = row_bytes * R                    # one batch element, one C block
    total_bytes = N * C * R * _LANE * _ITEMSIZE   # whole input

    if total_bytes <= _SINGLE_STEP_BYTES and nc == 1:
        # Tiny problem: a single grid step amortizes the ~0.35us/step overhead
        # better than feeding a second TensorCore.
        return N, R, cb

    if elem_bytes >= _TARGET_BLOCK_BYTES:
        # Tile the spatial rows inside a single batch element.
        nb = 1
        tr = min(R, max(1, _TARGET_BLOCK_BYTES // row_bytes))
        if tr < R:
            tr = max(_SUBLANE, (tr // _SUBLANE) * _SUBLANE)
    else:
        # Pack several batch elements per block (large-N / small-spatial case).
        nb = min(N, max(1, _TARGET_BLOCK_BYTES // elem_bytes))
        tr = R

    # v7x megacore: keep >= 2 steps on a "parallel" axis so both TensorCores
    # get work on non-tiny problems.
    if pl.cdiv(N, nb) * pl.cdiv(R, tr) < 2:
        if N >= 2:
            nb = pl.cdiv(N, 2)
        elif R >= 2 * _SUBLANE:
            tr = max(_SUBLANE, (pl.cdiv(R, 2) // _SUBLANE) * _SUBLANE)

    return nb, tr, cb


def _forward_lane_aligned(x4, N, C, R, out_dtype):
    nb, tr, cb = _choose_tiles(N, C, R)
    nc = pl.cdiv(C, cb)
    grid = (pl.cdiv(N, nb), pl.cdiv(R, tr), nc)

    kernel = functools.partial(_lane_aligned_kernel, total_c=C, num_c_blocks=nc)
    scratch = ([] if nc == 1
               else [pltpu.VMEM((nb, tr, _LANE), jnp.float32),
                     pltpu.VMEM((nb, tr, _LANE), jnp.float32)])

    return pl.pallas_call(
        kernel,
        out_shape=jax.ShapeDtypeStruct((N, R, _LANE), out_dtype),
        grid_spec=pltpu.PrefetchScalarGridSpec(
            num_scalar_prefetch=0,
            grid=grid,
            in_specs=[pl.BlockSpec((nb, cb, tr, _LANE),
                                   lambda n, r, c: (n, c, r, 0))],
            out_specs=pl.BlockSpec((nb, tr, _LANE),
                                   lambda n, r, c: (n, r, 0)),
            scratch_shapes=scratch,
        ),
        compiler_params=pltpu.CompilerParams(
            dimension_semantics=("parallel", "parallel", "arbitrary"),
            vmem_limit_bytes=_VMEM_LIMIT_BYTES,
        ),
    )(x4)


# --------------------------------------------------------------------------- #
# Fallback path: H*W not a multiple of 128 -> run on the (N, C, L) view
# (channels on the sublane axis) so the input never needs a padded HBM copy.
# --------------------------------------------------------------------------- #
def _flat_kernel(x_ref, o_ref):
    x = x_ref[...].astype(jnp.float32)                 # (nb, C, tcol)
    m = jnp.max(x, axis=1, keepdims=True)
    s = jnp.sum(jnp.exp(x - m), axis=1, keepdims=True)
    o_ref[...] = (-1.0 / s).astype(o_ref.dtype)        # (nb, 1, tcol)


def _forward_flat(x3, N, C, L, out_dtype):
    elem_bytes = C * L * _ITEMSIZE
    total_bytes = N * elem_bytes

    if total_bytes <= _SINGLE_STEP_BYTES:
        nb, tc = N, L
    elif elem_bytes <= _TARGET_BLOCK_BYTES:
        nb, tc = min(N, max(1, _TARGET_BLOCK_BYTES // elem_bytes)), L
    else:
        nb = 1
        tc = max(_LANE, (_TARGET_BLOCK_BYTES // (C * _ITEMSIZE)) // _LANE * _LANE)
        tc = min(tc, L)            # == L (full dim) or a multiple of 128

    # v7x megacore: keep >= 2 steps on a parallel axis for non-tiny problems.
    if total_bytes > _SINGLE_STEP_BYTES and pl.cdiv(N, nb) * pl.cdiv(L, tc) < 2:
        if N >= 2:
            nb = pl.cdiv(N, 2)
        elif L >= 2 * _LANE:
            tc = max(_LANE, (pl.cdiv(L, 2) // _LANE) * _LANE)

    grid = (pl.cdiv(N, nb), pl.cdiv(L, tc))
    return pl.pallas_call(
        _flat_kernel,
        out_shape=jax.ShapeDtypeStruct((N, 1, L), out_dtype),
        grid_spec=pltpu.PrefetchScalarGridSpec(
            num_scalar_prefetch=0,
            grid=grid,
            in_specs=[pl.BlockSpec((nb, C, tc), lambda n, j: (n, 0, j))],
            out_specs=pl.BlockSpec((nb, 1, tc), lambda n, j: (n, 0, j)),
        ),
        compiler_params=pltpu.CompilerParams(
            dimension_semantics=("parallel", "parallel"),
            vmem_limit_bytes=_VMEM_LIMIT_BYTES,
        ),
    )(x3)


# --------------------------------------------------------------------------- #
# Public wrapper
# --------------------------------------------------------------------------- #
def maximum_forward(x):
    """x: (N, C, H, W) -> (N, H, W);  y = -max(softmax(x, axis=1), axis=1)."""
    N, C, H, W = x.shape
    L = H * W
    x3 = x.reshape(N, C, L)

    if L > 0 and L % _LANE == 0:
        R = L // _LANE
        x4 = x3.reshape(N, C, R, _LANE)               # free: contiguous row-major
        out = _forward_lane_aligned(x4, N, C, R, x.dtype)   # (N, R, 128)
    else:
        # Unaligned spatial size: flat-layout kernel, no padded copy of x.
        out = _forward_flat(x3, N, C, L, x.dtype)           # (N, 1, L)
    return out.reshape(N, H, W)


def _reference(x):
    p = jax.nn.softmax(x.astype(jnp.float32), axis=1)
    return -jnp.max(p, axis=1)


if __name__ == "__main__":
    key = jax.random.PRNGKey(0)

    cases = [
        (2, 4, 16, 16),    # lane-aligned (H*W % 128 == 0), single C block
        (2, 4, 6, 10),     # flat fallback (H*W % 128 != 0)
        (1, 160, 16, 16),  # lane-aligned, C tiled over 2 blocks with tail mask
    ]
    for shape in cases:
        key, sub = jax.random.split(key)
        x = jax.random.normal(sub, shape, dtype=jnp.float32)
        y = maximum_forward(x)
        jax.block_until_ready(y)
        y_ref = _reference(x)
        assert y.shape == (shape[0], shape[2], shape[3])
        assert jnp.allclose(y, y_ref, atol=1e-5, rtol=1e-5), \
            f"mismatch vs reference for shape {shape}"

    print("KERNEL_OK")
</pallas_src>

<mosaic_0001>
module attributes {stable_mosaic.version = 11 : i64} {
  func.func @_lane_aligned_kernel(%arg0: i32, %arg1: i32, %arg2: i32, %arg3: memref<2x4x2x128xf32, #tpu.memory_space<vmem>>, %arg4: memref<2x2x128xf32, #tpu.memory_space<vmem>>) attributes {dimension_semantics = [#tpu.dimension_semantics<parallel>, #tpu.dimension_semantics<parallel>, #tpu.dimension_semantics<arbitrary>], iteration_bounds = array<i64: 1, 1, 1>, scalar_prefetch = 0 : i64, scratch_operands = 0 : i64, tpu.core_type = #tpu.core_type<tc>, window_params = [{transform_indices = @transform_0, window_bounds = array<i64: 2, 4, 2, 128>}, {transform_indices = @transform_1, window_bounds = array<i64: 2, 2, 128>}]} {
    %cst = arith.constant 0xFF800000 : f32
    %0 = vector.broadcast %cst : f32 to vector<2x2x128xf32>
    %c0 = arith.constant 0 : index
    %c0_0 = arith.constant 0 : index
    %c0_1 = arith.constant 0 : index
    %c0_2 = arith.constant 0 : index
    %1 = vector.load %arg3[%c0, %c0_0, %c0_1, %c0_2] : memref<2x4x2x128xf32, #tpu.memory_space<vmem>>, vector<2x1x2x128xf32>
    %2 = vector.shape_cast %1 : vector<2x1x2x128xf32> to vector<2x2x128xf32>
    %3 = arith.maximumf %0, %2 : vector<2x2x128xf32>
    %c0_3 = arith.constant 0 : index
    %c1 = arith.constant 1 : index
    %c0_4 = arith.constant 0 : index
    %c0_5 = arith.constant 0 : index
    %4 = vector.load %arg3[%c0_3, %c1, %c0_4, %c0_5] : memref<2x4x2x128xf32, #tpu.memory_space<vmem>>, vector<2x1x2x128xf32>
    %5 = vector.shape_cast %4 : vector<2x1x2x128xf32> to vector<2x2x128xf32>
    %6 = arith.maximumf %3, %5 : vector<2x2x128xf32>
    %c0_6 = arith.constant 0 : index
    %c2 = arith.constant 2 : index
    %c0_7 = arith.constant 0 : index
    %c0_8 = arith.constant 0 : index
    %7 = vector.load %arg3[%c0_6, %c2, %c0_7, %c0_8] : memref<2x4x2x128xf32, #tpu.memory_space<vmem>>, vector<2x1x2x128xf32>
    %8 = vector.shape_cast %7 : vector<2x1x2x128xf32> to vector<2x2x128xf32>
    %9 = arith.maximumf %6, %8 : vector<2x2x128xf32>
    %c0_9 = arith.constant 0 : index
    %c3 = arith.constant 3 : index
    %c0_10 = arith.constant 0 : index
    %c0_11 = arith.constant 0 : index
    %10 = vector.load %arg3[%c0_9, %c3, %c0_10, %c0_11] : memref<2x4x2x128xf32, #tpu.memory_space<vmem>>, vector<2x1x2x128xf32>
    %11 = vector.shape_cast %10 : vector<2x1x2x128xf32> to vector<2x2x128xf32>
    %12 = arith.maximumf %9, %11 : vector<2x2x128xf32>
    %cst_12 = arith.constant 0.000000e+00 : f32
    %13 = vector.broadcast %cst_12 : f32 to vector<2x2x128xf32>
    %c0_13 = arith.constant 0 : index
    %c0_14 = arith.constant 0 : index
    %c0_15 = arith.constant 0 : index
    %c0_16 = arith.constant 0 : index
    %14 = vector.load %arg3[%c0_13, %c0_14, %c0_15, %c0_16] : memref<2x4x2x128xf32, #tpu.memory_space<vmem>>, vector<2x1x2x128xf32>
    %15 = vector.shape_cast %14 : vector<2x1x2x128xf32> to vector<2x2x128xf32>
    %16 = arith.subf %15, %12 : vector<2x2x128xf32>
    %17 = math.exp %16 : vector<2x2x128xf32>
    %18 = arith.addf %13, %17 : vector<2x2x128xf32>
    %c0_17 = arith.constant 0 : index
    %c1_18 = arith.constant 1 : index
    %c0_19 = arith.constant 0 : index
    %c0_20 = arith.constant 0 : index
    %19 = vector.load %arg3[%c0_17, %c1_18, %c0_19, %c0_20] : memref<2x4x2x128xf32, #tpu.memory_space<vmem>>, vector<2x1x2x128xf32>
    %20 = vector.shape_cast %19 : vector<2x1x2x128xf32> to vector<2x2x128xf32>
    %21 = arith.subf %20, %12 : vector<2x2x128xf32>
    %22 = math.exp %21 : vector<2x2x128xf32>
    %23 = arith.addf %18, %22 : vector<2x2x128xf32>
    %c0_21 = arith.constant 0 : index
    %c2_22 = arith.constant 2 : index
    %c0_23 = arith.constant 0 : index
    %c0_24 = arith.constant 0 : index
    %24 = vector.load %arg3[%c0_21, %c2_22, %c0_23, %c0_24] : memref<2x4x2x128xf32, #tpu.memory_space<vmem>>, vector<2x1x2x128xf32>
    %25 = vector.shape_cast %24 : vector<2x1x2x128xf32> to vector<2x2x128xf32>
    %26 = arith.subf %25, %12 : vector<2x2x128xf32>
    %27 = math.exp %26 : vector<2x2x128xf32>
    %28 = arith.addf %23, %27 : vector<2x2x128xf32>
    %c0_25 = arith.constant 0 : index
    %c3_26 = arith.constant 3 : index
    %c0_27 = arith.constant 0 : index
    %c0_28 = arith.constant 0 : index
    %29 = vector.load %arg3[%c0_25, %c3_26, %c0_27, %c0_28] : memref<2x4x2x128xf32, #tpu.memory_space<vmem>>, vector<2x1x2x128xf32>
    %30 = vector.shape_cast %29 : vector<2x1x2x128xf32> to vector<2x2x128xf32>
    %31 = arith.subf %30, %12 : vector<2x2x128xf32>
    %32 = math.exp %31 : vector<2x2x128xf32>
    %33 = arith.addf %28, %32 : vector<2x2x128xf32>
    %cst_29 = arith.constant -1.000000e+00 : f32
    %34 = vector.broadcast %cst_29 : f32 to vector<2x2x128xf32>
    %35 = arith.divf %34, %33 : vector<2x2x128xf32>
    %c0_30 = arith.constant 0 : index
    %c0_31 = arith.constant 0 : index
    %c0_32 = arith.constant 0 : index
    %36 = vector.load %arg4[%c0_30, %c0_31, %c0_32] : memref<2x2x128xf32, #tpu.memory_space<vmem>>, vector<2x2x128xf32>
    tpu.vector_store %arg4[%c0_30, %c0_31, %c0_32], %35 {strides = array<i32>} : memref<2x2x128xf32, #tpu.memory_space<vmem>>, vector<2x2x128xf32>,
    return
  }
  func.func @transform_0(%arg0: i32, %arg1: i32, %arg2: i32) -> (i32, i32, i32, i32) {
    %c0_i32 = arith.constant 0 : i32
    %c0_i32_0 = arith.constant 0 : i32
    return %arg0, %arg2, %arg1, %c0_i32 : i32, i32, i32, i32
  }
  func.func @transform_1(%arg0: i32, %arg1: i32, %arg2: i32) -> (i32, i32, i32) {
    %c0_i32 = arith.constant 0 : i32
    %c0_i32_0 = arith.constant 0 : i32
    return %arg0, %arg1, %c0_i32 : i32, i32, i32
  }
}

</mosaic_0001>

<bundles_post_ra>
// kernel: tpu_custom_call.1
= control target key start
LH: loop header
LB: loop body
LE: loop exit
PB: predicated region body
PF: predicated region fallthrough
CT: control target
= control target key end

     0   :  { %6 = vsyncpa [#allocation3], 0  ;;  %s227_s0 = inlined_call_operand.hbm [shape: f32[2,4,2,128], index: 0, kind: input, shape index: {}]   ;;  %s228_s1 = inlined_call_operand.hbm [shape: f32[2,2,128], index: 1, kind: output, shape index: {}]  }
   0x1   :  { %7 = vsyncpa [#allocation4], 0  ;;  %s12_s8 = sshll.u32 %s227_s0, 4  ;;  %s201_s9 = smov [#allocation2]   ;;  %s13_s8 = int_to_ptr.hbm [resolvable:$true] %s12_s8 }
   0x2   :  { %s14_s10 = sshll.u32 %s201_s9, 4  ;;  %s202_s11 = smov 32   ;;  %s15_s10 = int_to_ptr.vmem [resolvable:$true] %s14_s10 }
   0x3   :  { %s203_s12 = smov 2  }
   0x4   :  { %20 = dma.hbm_to_vmem [thread:$0]  %s13_s8, 256, %s15_s10, [#allocation3], %s202_s11, %s202_s11, %s203_s12  }
   0x5   :  { %197 = dma.done.wait [#allocation3], 256  }
   0x6   :  { %198 = vsyncadd [#allocation3], 4294967040  ;;  %v25_v0 = vld [vmem:[#allocation2] sm:$0x3]  ;;  %v28_v1 = vld [vmem:[#allocation2 + $0x2] sm:$0x3] }
   0x7   :  { %v33_v2 = vld [vmem:[#allocation2 + $0x4] sm:$0x3]  ;;  %v30_v3 = vmax.f32 %v25_v0, %v28_v1  ;;  %v26_v4 = vld [vmem:[#allocation2 + $0x8] sm:$0x3]  ;;  %v29_v5 = vld [vmem:[#allocation2 + $0xa] sm:$0x3] }
   0x8   :  { %v38_v6 = vld [vmem:[#allocation2 + $0x6] sm:$0x3]  ;;  %v31_v7 = vmax.f32 %v26_v4, %v29_v5  ;;  %v34_v8 = vld [vmem:[#allocation2 + $0xc] sm:$0x3]  ;;  %v39_v10 = vld [vmem:[#allocation2 + $0xe] sm:$0x3] }
   0x9   :  { %v35_v9 = vmax.f32 %v30_v3, %v33_v2  ;;  %s204_s0 = smov [#allocation5]   ;;  %s112_s16 = sshll.u32 %s228_s1, 4  ;;  %s113_s16 = int_to_ptr.hbm [resolvable:$true] %s112_s16 }
   0xa   :  { %v36_v11 = vmax.f32 %v31_v7, %v34_v8  ;;  %s110_s13 = sshll.u32 %s204_s0, 4  ;;  %s111_s13 = int_to_ptr.vmem [resolvable:$true] %s110_s13 }
   0xb   :  { %v40_v12 = vmax.f32 %v35_v9, %v38_v6 }
   0xc   :  { %v41_v13 = vmax.f32 %v36_v11, %v39_v10 }
   0xd   :  { %v42_v14 = vsub.f32 %v25_v0, %v40_v12  ;;  %v50_v15 = vsub.f32 %v28_v1, %v40_v12  ;;  %v58_v16 = vsub.f32 %v33_v2, %v40_v12  ;;  %v66_v17 = vsub.f32 %v38_v6, %v40_v12 }
   0xe   :  { %v43_v18 = vsub.f32 %v26_v4, %v41_v13  ;;  %v51_v19 = vsub.f32 %v29_v5, %v41_v13  ;;  %v59_v23 = vsub.f32 %v34_v8, %v41_v13  ;;  %v67_v26 = vsub.f32 %v39_v10, %v41_v13 }
   0xf   :  { %v44_v20 = vmul.f32 1.442695, %v42_v14  ;;  %v52_v21 = vmul.f32 1.442695, %v50_v15  ;;  %v60_v22 = vmul.f32 1.442695, %v58_v16 }
  0x10   :  { %v68_v24 = vmul.f32 1.442695, %v66_v17  ;;  %v46_v25 = vmul.f32 1.442695, %v43_v18  ;;  %v54_v27 = vmul.f32 1.442695, %v51_v19 }
  0x11   :  { %129 = vpow2.f32 %v44_v20  ;;  %v62_v28 = vmul.f32 1.442695, %v59_v23  ;;  %v70_v29 = vmul.f32 1.442695, %v67_v26 }
  0x12   :  { %131 = vpow2.f32 %v52_v21 }
  0x13   :  { %133 = vpow2.f32 %v60_v22 }
  0x14   :  { %135 = vpow2.f32 %v68_v24 }
  0x15   :  { %137 = vpow2.f32 %v46_v25 }
  0x16   :  { %139 = vpow2.f32 %v54_v27 }
  0x17   :  { %v130_v30 = vpop.eup %129  ;;  %141 = vpow2.f32 %v62_v28 }
  0x18   :  { %v132_v31 = vpop.eup %131  ;;  %143 = vpow2.f32 %v70_v29 }
  0x19   :  { %v134_v32 = vpop.eup %133  ;;  %v56_v33 = vadd.f32 %v132_v31, %v130_v30 }
  0x1a   :  { %v136_v34 = vpop.eup %135 }
  0x1b   :  { %v138_v35 = vpop.eup %137  ;;  %v64_v36 = vadd.f32 %v134_v32, %v56_v33 }
  0x1c   :  { %v140_v37 = vpop.eup %139 }
  0x1d   :  { %v142_v38 = vpop.eup %141  ;;  %v72_v39 = vadd.f32 %v136_v34, %v64_v36  ;;  %v57_v40 = vadd.f32 %v140_v37, %v138_v35 }
  0x1e   :  { %v144_v41 = vpop.eup %143 }
  0x1f   :  { %145 = vrcp.f32 %v72_v39  ;;  %v65_v42 = vadd.f32 %v142_v38, %v57_v40  ;;  %v85_v46 = vand.u32 2147483648, %v72_v39  ;;  %vm79_vm0 = vweird.f32 %v72_v39 }
  0x20   :  { %v83_v48 = vand.u32 2147483647, %v72_v39 }
  0x21   :  { %v73_v43 = vadd.f32 %v144_v41, %v65_v42  ;;  %v86_v51 = vor.u32 1.1754944e-38, %v85_v46 }
  0x22   :  { %vm84_vm3 = vcmp.eq.f32.partialorder %v83_v48, 8.507059e+37 }
  0x23   :  { %147 = vrcp.f32 %v73_v43  ;;  %v100_v54 = vand.u32 2147483648, %v73_v43  ;;  %vm94_vm4 = vweird.f32 %v73_v43  ;;  %v98_v56 = vand.u32 2147483647, %v73_v43 }
  0x25   :  { %v146_v44 = vpop.eup %145  ;;  %v101_v61 = vor.u32 1.1754944e-38, %v100_v54  ;;  %vm99_vm7 = vcmp.eq.f32.partialorder %v98_v56, 8.507059e+37 }
  0x26   :  { %v75_v45 = vmul.f32 %v146_v44, %v72_v39  ;;  %vm80_vm1 = vweird.f32 %v146_v44 }
  0x27   :  { %vm81_vm2 = vmor %vm79_vm0, %vm80_vm1 }
  0x28   :  { %v76_v47 = vsub.f32 1.0, %v75_v45 }
  0x29   :  { %v148_v49 = vpop.eup %147 }
  0x2a   :  { %v77_v50 = vmul.f32 %v146_v44, %v76_v47  ;;  %v90_v52 = vmul.f32 %v148_v49, %v73_v43  ;;  %vm95_vm5 = vweird.f32 %v148_v49 }
  0x2b   :  { %vm96_vm6 = vmor %vm94_vm4, %vm95_vm5 }
  0x2c   :  { %v78_v53 = vadd.f32 %v146_v44, %v77_v50  ;;  %v91_v55 = vsub.f32 1.0, %v90_v52 }
  0x2e   :  { %v82_v57 = vsel %vm81_vm2, %v146_v44, %v78_v53  ;;  %v92_v59 = vmul.f32 %v148_v49, %v91_v55 }
  0x2f   :  { %v87_v58 = vsel %vm84_vm3, %v86_v51, %v82_v57 }
  0x30   :  { %v88_v60 = vmul.f32 -1.0, %v87_v58  ;;  %v93_v62 = vadd.f32 %v148_v49, %v92_v59 }
  0x32   :  { %104 = vst [vmem:[#allocation5] sm:$0x3] %v88_v60  ;;  %v97_v63 = vsel %vm96_vm6, %v148_v49, %v93_v62 }
  0x33   :  { %v102_v0 = vsel %vm99_vm7, %v101_v61, %v97_v63 }
  0x34   :  { %v103_v1 = vmul.f32 -1.0, %v102_v0 }
  0x36   :  { %105 = vst [vmem:[#allocation5 + $0x2] sm:$0x3] %v103_v1 }
  0x37   :  { %118 = dma.vmem_to_hbm [thread:$0]  %s111_s13, 64, %s113_s16, [#allocation4], %s202_s11, %s202_s11, %s203_s12  }
  0x38   :  { %199 = dma.done.wait [#allocation4], 64  }
  0x39   :  { %200 = vsyncadd [#allocation4], 4294967232 }
  0x3a   :  { %123 = vsyncpa [#allocation3], 1 }
  0x3b   :  { %124 = vsyncpa [#allocation4], 1 }

</bundles_post_ra>
